<compile_context>
chip_gen: v7x
topology: tpu7x:2x2x1
jax: 0.10.0
libtpu: 0.0.40
codegen_flags: <defaults>
</compile_context>

<pallas_src>
import jax
import jax.numpy as jnp
from jax import lax
from jax.experimental import pallas as pl
from jax.experimental.pallas import tpu as pltpu
from typing import NamedTuple


def _round_up(n, m):
    return ((n + m - 1) // m) * m


def _pad2(a, rows, cols):
    pr, pc = rows - a.shape[0], cols - a.shape[1]
    if pr == 0 and pc == 0:
        return a
    return jnp.pad(a, ((0, pr), (0, pc)))


def _vmem_capacity_bytes():
    try:
        return int(pltpu.get_tpu_info().vmem_capacity_bytes)
    except Exception:
        # Conservative fallback = v7x per-TensorCore VMEM.
        return 64 * 1024 * 1024


def _pick_tile_plan():
    vmem = _vmem_capacity_bytes()
    if vmem >= 100 * 1024 * 1024:
        # v5e / v6e: 128 MiB VMEM -> large row tiles to escape the W-streaming
        # memory roofline (arithmetic intensity ~ 2*tm / bytes_per_elem).
        return dict(tm=1024, tn=256, tk=512, vmem_limit=96 * 1024 * 1024)
    # v7x: 64 MiB per TensorCore -> leave headroom for double buffers,
    # accumulator scratch and internal compiler scratch.
    return dict(tm=512, tn=256, tk=512, vmem_limit=40 * 1024 * 1024)


class LoraLinearParams(NamedTuple):
    """Pre-padded, pre-scaled, (optionally) pre-cast frozen weights."""
    w: jax.Array        # (Np, Kp)  base weight, PyTorch [out, in] layout
    b: jax.Array        # (1, Np)   bias, f32
    lora_a: jax.Array   # (r_pad, Kp)
    lora_b: jax.Array   # (Np, r_pad), pre-scaled by alpha/r
    n: int              # logical out_features
    k: int              # logical in_features
    tn: int
    tk: int


def prepare_lora_linear(w, b, lora_a, lora_b, *, alpha=16.0, r=None,
                        compute_dtype=None, tn=None, tk=None):
    """One-time (load-time) weight preparation: pad, fold alpha/r, cast."""
    N, K = w.shape
    r_eff = lora_a.shape[0]
    scaling = float(alpha) / float(r if r is not None else r_eff)

    plan = _pick_tile_plan()
    tn = tn if tn is not None else plan["tn"]
    tk = tk if tk is not None else plan["tk"]
    # Lane/sublane alignment; tiny problems collapse to a single tile.
    tn = _round_up(min(tn, _round_up(N, 128)), 128)
    tk = _round_up(min(tk, _round_up(K, 128)), 128)
    Np = _round_up(N, tn)
    Kp = _round_up(K, tk)
    r_pad = max(8, _round_up(r_eff, 8))

    if compute_dtype is None:
        compute_dtype = w.dtype
    wp = _pad2(w, Np, Kp).astype(compute_dtype)
    ap = _pad2(lora_a, r_pad, Kp).astype(compute_dtype)
    lbp = _pad2(lora_b * scaling, Np, r_pad).astype(compute_dtype)  # fold alpha/r
    bp = jnp.pad(b, (0, Np - N)).astype(jnp.float32).reshape(1, Np)
    return LoraLinearParams(wp, bp, ap, lbp, N, K, tn, tk)


def _lora_linear_kernel(x_ref, w_ref, b_ref, a_ref, lb_ref, o_ref,
                        acc_ref, mid_ref):
    # x_ref  : (tm, tk)      activation slab
    # w_ref  : (tn, tk)      frozen base weight slab, [out, in] layout
    # b_ref  : (1, tn)       bias slab (f32)
    # a_ref  : (r_pad, tk)   LoRA A slab, [r, in] layout
    # lb_ref : (tn, r_pad)   LoRA B slab, [out, r] layout (pre-scaled)
    # o_ref  : (tm, tn)
    # acc_ref: (tm, tn) f32  base accumulator over K
    # mid_ref: (tm, r_pad) f32  cached x @ A^T for the current row tile
    j = pl.program_id(1)
    k = pl.program_id(2)
    nk = pl.num_programs(2)

    x = x_ref[...]

    @pl.when(k == 0)
    def _():
        acc_ref[...] = jnp.zeros_like(acc_ref)

    # Base path: accumulate x @ W^T over K slabs (contract K axis of both
    # operands -> no transpose of W ever materialized).
    acc_ref[...] += lax.dot_general(
        x, w_ref[...], (((1,), (1,)), ((), ())),
        preferred_element_type=jnp.float32)

    # LoRA rank-r intermediate: computed only on the first N tile of each row
    # tile, accumulated over K, then reused by every subsequent N tile.
    @pl.when(j == 0)
    def _():
        @pl.when(k == 0)
        def _():
            mid_ref[...] = jnp.zeros_like(mid_ref)
        mid_ref[...] += lax.dot_general(
            x, a_ref[...], (((1,), (1,)), ((), ())),
            preferred_element_type=jnp.float32)

    # Epilogue on the last K slab: bias + LoRA up-projection + writeback.
    @pl.when(k == nk - 1)
    def _():
        mid = mid_ref[...].astype(lb_ref.dtype)
        lora = lax.dot_general(
            mid, lb_ref[...], (((1,), (1,)), ((), ())),
            preferred_element_type=jnp.float32)
        o_ref[...] = (acc_ref[...] + b_ref[...] + lora).astype(o_ref.dtype)


def lora_linear(x, params: LoraLinearParams, *, tm=None, out_dtype=None):
    """LoRA linear forward: y = x @ W^T + b + (alpha/r) * ((x @ A^T) @ B^T).

    x: [M, K] rows; weights come pre-prepared from prepare_lora_linear().
    """
    M, K = x.shape
    assert K == params.k, "in_features mismatch"
    Np, Kp = params.w.shape
    r_pad = params.lora_a.shape[0]
    tn, tk = params.tn, params.tk
    N = params.n

    plan = _pick_tile_plan()
    tm = tm if tm is not None else plan["tm"]
    tm = _round_up(min(tm, _round_up(M, 128)), 128)
    Mp = _round_up(M, tm)

    out_dtype = out_dtype if out_dtype is not None else x.dtype
    # Only the activation gets padded per call (ragged M edge + K lane pad).
    xp = _pad2(x, Mp, Kp).astype(params.w.dtype)

    grid = (Mp // tm, Np // tn, Kp // tk)

    itemsize = jnp.dtype(params.w.dtype).itemsize
    flops = 2 * Mp * Np * Kp + 2 * Mp * r_pad * Kp + 2 * Mp * Np * r_pad
    bytes_accessed = (
        xp.size * itemsize * (Np // tn)             # x re-streamed per N tile
        + params.w.size * itemsize * (Mp // tm)     # W re-streamed per M tile
        + params.lora_a.size * itemsize
        + params.lora_b.size * itemsize
        + params.b.size * 4
        + Mp * Np * jnp.dtype(out_dtype).itemsize)
    cost = pl.CostEstimate(flops=int(flops), transcendentals=0,
                           bytes_accessed=int(bytes_accessed))

    out_p = pl.pallas_call(
        _lora_linear_kernel,
        out_shape=jax.ShapeDtypeStruct((Mp, Np), out_dtype),
        grid_spec=pltpu.PrefetchScalarGridSpec(
            num_scalar_prefetch=0,
            grid=grid,
            in_specs=[
                pl.BlockSpec((tm, tk), lambda i, j, k: (i, k)),      # x slab
                pl.BlockSpec((tn, tk), lambda i, j, k: (j, k)),      # W slab
                pl.BlockSpec((1, tn), lambda i, j, k: (0, j)),       # bias slab
                pl.BlockSpec((r_pad, tk), lambda i, j, k: (0, k)),   # LoRA A
                pl.BlockSpec((tn, r_pad), lambda i, j, k: (j, 0)),   # LoRA B
            ],
            out_specs=pl.BlockSpec((tm, tn), lambda i, j, k: (i, j)),
            scratch_shapes=[
                pltpu.VMEM((tm, tn), jnp.float32),      # base accumulator
                pltpu.VMEM((tm, r_pad), jnp.float32),   # cached x @ A^T
            ],
        ),
        compiler_params=pltpu.CompilerParams(
            # j (N tiles) and k (K slabs) carry VMEM scratch across steps ->
            # "arbitrary"; only the row-tile axis is megacore-parallel.
            dimension_semantics=("parallel", "arbitrary", "arbitrary"),
            vmem_limit_bytes=plan["vmem_limit"],
        ),
        cost_estimate=cost,
    )(xp, params.w, params.b, params.lora_a, params.lora_b)

    return out_p[:M, :N]


def lora_linear_ref(x, w, b, lora_a, lora_b, *, alpha=16.0, r=None):
    scaling = float(alpha) / float(r if r is not None else lora_a.shape[0])
    return x @ w.T + b[None, :] + scaling * ((x @ lora_a.T) @ lora_b.T)


if __name__ == "__main__":
    # Small shapes consistent with a LoRA-wrapped SEQ_CLS linear head:
    # batch=2, seq=8 -> M=16 rows; hidden=32; out_features=32; LoRA r=8, alpha=16
    batch, seq, hidden, out_features, r, alpha = 2, 8, 32, 32, 8, 16
    M = batch * seq

    key = jax.random.PRNGKey(0)
    kx, kw, kb, ka, kbm = jax.random.split(key, 5)

    x = jax.random.normal(kx, (batch, seq, hidden), dtype=jnp.float32)
    w = jax.random.normal(kw, (out_features, hidden), dtype=jnp.float32) * 0.05
    b = jax.random.normal(kb, (out_features,), dtype=jnp.float32) * 0.01
    # PEFT default init sets lora_B = 0 (adapter contributes nothing at init);
    # use nonzero deterministic values so the LoRA path is exercised.
    lora_a = jax.random.normal(ka, (r, hidden), dtype=jnp.float32) * 0.05
    lora_b = jax.random.normal(kbm, (out_features, r), dtype=jnp.float32) * 0.05

    x2d = x.reshape(M, hidden)   # layout: [batch*seq, hidden]
    ref = lora_linear_ref(x2d, w, b, lora_a, lora_b, alpha=alpha)

    # f32 compute path (tight reference check).
    params_f32 = prepare_lora_linear(w, b, lora_a, lora_b, alpha=alpha)
    out = jax.block_until_ready(lora_linear(x2d, params_f32))
    assert out.shape == (M, out_features)
    assert jnp.allclose(out, ref, atol=1e-4, rtol=1e-4), "f32 mismatch vs reference"

    # bf16 MXU path (f32 accumulation + f32 output; loose check).
    params_bf16 = prepare_lora_linear(w, b, lora_a, lora_b, alpha=alpha,
                                      compute_dtype=jnp.bfloat16)
    out_bf16 = jax.block_until_ready(lora_linear(x2d, params_bf16))
    assert out_bf16.shape == (M, out_features)
    assert jnp.allclose(out_bf16, ref, atol=5e-2, rtol=5e-2), "bf16 mismatch vs reference"

    # TODO(synk): generate()/state_dict()/load_state_dict()/save_model() and
    # the peft/adapterhub config plumbing in enable_adapter() are host-side
    # model management with no tensor compute — no Pallas equivalent.
    print("KERNEL_OK")
</pallas_src>

<mosaic_0001>
module attributes {stable_mosaic.version = 11 : i64} {
  func.func @_lora_linear_kernel(%arg0: i32, %arg1: i32, %arg2: i32, %arg3: memref<128x128xf32, #tpu.memory_space<vmem>>, %arg4: memref<128x128xf32, #tpu.memory_space<vmem>>, %arg5: memref<1x128xf32, #tpu.memory_space<vmem>>, %arg6: memref<8x128xf32, #tpu.memory_space<vmem>>, %arg7: memref<128x8xf32, #tpu.memory_space<vmem>>, %arg8: memref<128x128xf32, #tpu.memory_space<vmem>>, %arg9: memref<128x128xf32, #tpu.memory_space<vmem>>, %arg10: memref<128x8xf32, #tpu.memory_space<vmem>>) attributes {dimension_semantics = [#tpu.dimension_semantics<parallel>, #tpu.dimension_semantics<arbitrary>, #tpu.dimension_semantics<arbitrary>], iteration_bounds = array<i64: 1, 1, 1>, scalar_prefetch = 0 : i64, scratch_operands = 2 : i64, tpu.core_type = #tpu.core_type<tc>, window_params = [{transform_indices = @transform_0, window_bounds = array<i64: 128, 128>}, {transform_indices = @transform_1, window_bounds = array<i64: 128, 128>}, {transform_indices = @transform_2, window_bounds = array<i64: 1, 128>}, {transform_indices = @transform_3, window_bounds = array<i64: 8, 128>}, {transform_indices = @transform_4, window_bounds = array<i64: 128, 8>}, {transform_indices = @transform_5, window_bounds = array<i64: 128, 128>}]} {
    %c0 = arith.constant 0 : index
    %c0_0 = arith.constant 0 : index
    %0 = vector.load %arg3[%c0, %c0_0] : memref<128x128xf32, #tpu.memory_space<vmem>>, vector<128x128xf32>
    %c0_i32 = arith.constant 0 : i32
    %1 = arith.cmpi eq, %arg2, %c0_i32 : i32
    %2 = arith.extui %1 : i1 to i32
    %c0_i32_1 = arith.constant 0 : i32
    %3 = arith.cmpi ne, %2, %c0_i32_1 : i32
    scf.if %3 {
      %cst_12 = arith.constant 0.000000e+00 : f32
      %15 = vector.broadcast %cst_12 : f32 to vector<128x128xf32>
      %c0_13 = arith.constant 0 : index
      %c0_14 = arith.constant 0 : index
      %16 = vector.load %arg9[%c0_13, %c0_14] : memref<128x128xf32, #tpu.memory_space<vmem>>, vector<128x128xf32>
      tpu.vector_store %arg9[%c0_13, %c0_14], %15 {strides = array<i32>} : memref<128x128xf32, #tpu.memory_space<vmem>>, vector<128x128xf32>,
    } else {
    }
    %c0_2 = arith.constant 0 : index
    %c0_3 = arith.constant 0 : index
    %4 = vector.load %arg9[%c0_2, %c0_3] : memref<128x128xf32, #tpu.memory_space<vmem>>, vector<128x128xf32>
    %c0_4 = arith.constant 0 : index
    %c0_5 = arith.constant 0 : index
    %5 = vector.load %arg4[%c0_4, %c0_5] : memref<128x128xf32, #tpu.memory_space<vmem>>, vector<128x128xf32>
    %cst = arith.constant dense<0.000000e+00> : vector<128x128xf32>
    %6 = tpu.matmul %0, %5, %cst {dimension_numbers = #tpu.dot_dimension_numbers<[1], [1], [0], [0], [0, 0, 1, 0], [], []>} : vector<128x128xf32>, vector<128x128xf32>, vector<128x128xf32> -> vector<128x128xf32>
    %7 = arith.addf %4, %6 : vector<128x128xf32>
    %c0_6 = arith.constant 0 : index
    %c0_7 = arith.constant 0 : index
    %8 = vector.load %arg9[%c0_6, %c0_7] : memref<128x128xf32, #tpu.memory_space<vmem>>, vector<128x128xf32>
    tpu.vector_store %arg9[%c0_6, %c0_7], %7 {strides = array<i32>} : memref<128x128xf32, #tpu.memory_space<vmem>>, vector<128x128xf32>,
    %c0_i32_8 = arith.constant 0 : i32
    %9 = arith.cmpi eq, %arg1, %c0_i32_8 : i32
    %10 = arith.extui %9 : i1 to i32
    %c0_i32_9 = arith.constant 0 : i32
    %11 = arith.cmpi ne, %10, %c0_i32_9 : i32
    scf.if %11 {
      %c0_i32_12 = arith.constant 0 : i32
      %15 = arith.cmpi eq, %arg2, %c0_i32_12 : i32
      %16 = arith.extui %15 : i1 to i32
      %c0_i32_13 = arith.constant 0 : i32
      %17 = arith.cmpi ne, %16, %c0_i32_13 : i32
      scf.if %17 {
        %cst_21 = arith.constant 0.000000e+00 : f32
        %23 = vector.broadcast %cst_21 : f32 to vector<128x8xf32>
        %c0_22 = arith.constant 0 : index
        %c0_23 = arith.constant 0 : index
        %24 = vector.load %arg10[%c0_22, %c0_23] : memref<128x8xf32, #tpu.memory_space<vmem>>, vector<128x8xf32>
        tpu.vector_store %arg10[%c0_22, %c0_23], %23 {strides = array<i32>} : memref<128x8xf32, #tpu.memory_space<vmem>>, vector<128x8xf32>,
      } else {
      }
      %c0_14 = arith.constant 0 : index
      %c0_15 = arith.constant 0 : index
      %18 = vector.load %arg10[%c0_14, %c0_15] : memref<128x8xf32, #tpu.memory_space<vmem>>, vector<128x8xf32>
      %c0_16 = arith.constant 0 : index
      %c0_17 = arith.constant 0 : index
      %19 = vector.load %arg6[%c0_16, %c0_17] : memref<8x128xf32, #tpu.memory_space<vmem>>, vector<8x128xf32>
      %cst_18 = arith.constant dense<0.000000e+00> : vector<128x8xf32>
      %20 = tpu.matmul %0, %19, %cst_18 {dimension_numbers = #tpu.dot_dimension_numbers<[1], [1], [0], [0], [0, 0, 1, 0], [], []>} : vector<128x128xf32>, vector<8x128xf32>, vector<128x8xf32> -> vector<128x8xf32>
      %21 = arith.addf %18, %20 : vector<128x8xf32>
      %c0_19 = arith.constant 0 : index
      %c0_20 = arith.constant 0 : index
      %22 = vector.load %arg10[%c0_19, %c0_20] : memref<128x8xf32, #tpu.memory_space<vmem>>, vector<128x8xf32>
      tpu.vector_store %arg10[%c0_19, %c0_20], %21 {strides = array<i32>} : memref<128x8xf32, #tpu.memory_space<vmem>>, vector<128x8xf32>,
    } else {
    }
    %c0_i32_10 = arith.constant 0 : i32
    %12 = arith.cmpi eq, %arg2, %c0_i32_10 : i32
    %13 = arith.extui %12 : i1 to i32
    %c0_i32_11 = arith.constant 0 : i32
    %14 = arith.cmpi ne, %13, %c0_i32_11 : i32
    scf.if %14 {
      %c0_12 = arith.constant 0 : index
      %c0_13 = arith.constant 0 : index
      %15 = vector.load %arg10[%c0_12, %c0_13] : memref<128x8xf32, #tpu.memory_space<vmem>>, vector<128x8xf32>
      %c0_14 = arith.constant 0 : index
      %c0_15 = arith.constant 0 : index
      %16 = vector.load %arg7[%c0_14, %c0_15] : memref<128x8xf32, #tpu.memory_space<vmem>>, vector<128x8xf32>
      %cst_16 = arith.constant dense<0.000000e+00> : vector<128x128xf32>
      %17 = tpu.matmul %15, %16, %cst_16 {dimension_numbers = #tpu.dot_dimension_numbers<[1], [1], [0], [0], [0, 0, 1, 0], [], []>} : vector<128x8xf32>, vector<128x8xf32>, vector<128x128xf32> -> vector<128x128xf32>
      %c0_17 = arith.constant 0 : index
      %c0_18 = arith.constant 0 : index
      %18 = vector.load %arg9[%c0_17, %c0_18] : memref<128x128xf32, #tpu.memory_space<vmem>>, vector<128x128xf32>
      %c0_19 = arith.constant 0 : index
      %c0_20 = arith.constant 0 : index
      %19 = vector.load %arg5[%c0_19, %c0_20] : memref<1x128xf32, #tpu.memory_space<vmem>>, vector<1x128xf32>
      %20 = vector.broadcast %19 : vector<1x128xf32> to vector<128x128xf32>
      %21 = arith.addf %18, %20 : vector<128x128xf32>
      %22 = arith.addf %21, %17 : vector<128x128xf32>
      %c0_21 = arith.constant 0 : index
      %c0_22 = arith.constant 0 : index
      %23 = vector.load %arg8[%c0_21, %c0_22] : memref<128x128xf32, #tpu.memory_space<vmem>>, vector<128x128xf32>
      tpu.vector_store %arg8[%c0_21, %c0_22], %22 {strides = array<i32>} : memref<128x128xf32, #tpu.memory_space<vmem>>, vector<128x128xf32>,
    } else {
    }
    return
  }
  func.func @transform_0(%arg0: i32, %arg1: i32, %arg2: i32) -> (i32, i32) {
    %c0_i32 = arith.constant 0 : i32
    return %arg0, %arg2 : i32, i32
  }
  func.func @transform_1(%arg0: i32, %arg1: i32, %arg2: i32) -> (i32, i32) {
    %c0_i32 = arith.constant 0 : i32
    return %arg1, %arg2 : i32, i32
  }
  func.func @transform_2(%arg0: i32, %arg1: i32, %arg2: i32) -> (i32, i32) {
    %c0_i32 = arith.constant 0 : i32
    %c0_i32_0 = arith.constant 0 : i32
    return %c0_i32, %arg1 : i32, i32
  }
  func.func @transform_3(%arg0: i32, %arg1: i32, %arg2: i32) -> (i32, i32) {
    %c0_i32 = arith.constant 0 : i32
    %c0_i32_0 = arith.constant 0 : i32
    return %c0_i32, %arg2 : i32, i32
  }
  func.func @transform_4(%arg0: i32, %arg1: i32, %arg2: i32) -> (i32, i32) {
    %c0_i32 = arith.constant 0 : i32
    %c0_i32_0 = arith.constant 0 : i32
    return %arg1, %c0_i32 : i32, i32
  }
  func.func @transform_5(%arg0: i32, %arg1: i32, %arg2: i32) -> (i32, i32) {
    %c0_i32 = arith.constant 0 : i32
    return %arg0, %arg1 : i32, i32
  }
}

</mosaic_0001>

<bundles_post_ra>
// kernel: tpu_custom_call.1
= control target key start
LH: loop header
LB: loop body
LE: loop exit
PB: predicated region body
PF: predicated region fallthrough
CT: control target
= control target key end

     0   :  { %10 = vsyncpa [#allocation5], 0  ;;  %s1607_s0 = inlined_call_operand.vmem [shape: f32[128,128], index: 0, kind: input, shape index: {}]   ;;  %s1608_s1 = inlined_call_operand.hbm [shape: f32[128,128], index: 1, kind: input, shape index: {}]   ;;  %s1609_s2 = inlined_call_operand.vmem [shape: f32[1,128], index: 2, kind: input, shape index: {}]   ;;  %s1610_s3 = inlined_call_operand.vmem [shape: f32[8,128], index: 3, kind: input, shape index: {}]   ;;  %s1611_s4 = inlined_call_operand.vmem [shape: f32[128,8], index: 4, kind: input, shape index: {}]   ;;  %s1612_s5 = inlined_call_operand.hbm [shape: f32[128,128], index: 5, kind: output, shape index: {}]  }
   0x1   :  { %11 = vsyncpa [#allocation6], 0  ;;  %s1281_s18 = smov [#allocation4]   ;;  %s1233_s22 = scalar_lea.hbm %s1608_s1, 2048 }
   0x2   :  { %s19_s19 = sshll.u32 %s1281_s18, 4  ;;  %p1234_p0 = scmp.ne.s32.totalorder %s1608_s1, %s1233_s22  ;;  %s20_s19 = int_to_ptr.vmem [resolvable:$true] %s19_s19 }
   0x3   :  { %p1237_p1 = scmp.lt.u32.totalorder %s1233_s22, %s1608_s1 }
   0x5   :  { %p1239_p2 = pnand %p1237_p1, %p1234_p0 }
   0x7   :  { %1242 = shalt.err (!%p1239_p2)
}
   0x8   :  { %s1243_s27 = scalar_lea.vmem %s20_s19, 2048  ;;  %p1248_p4 = scmp.lt.s32.totalorder %s20_s19, %s20_s19 }
   0x9   :  { %p1244_p3 = scmp.ne.s32.totalorder %s20_s19, %s1243_s27  ;;  %p1249_p5 = scmp.lt.s32.totalorder %s1243_s27, %s1243_s27 }
   0xb   :  { %p1250_p6 = por %p1249_p5, %p1248_p4 }
   0xd   :  { %p1251_p7 = pnand %p1250_p6, %p1244_p3 }
   0xf   :  { %1254 = shalt.err (!%p1251_p7)
}
  0x10   :  { %s1282_s28 = smov 128   ;;  %s1283_s29 = smov 8  }
  0x11   :  { %25 = dma.hbm_to_vmem [thread:$0]  %s1608_s1, 2048, %s20_s19, [#allocation5], %s1282_s28, %s1282_s28, %s1283_s29  }
  0x12   :  { %1277 = dma.done.wait [#allocation5], 2048  }
  0x13   :  { %1278 = vsyncadd [#allocation5], 4294965248  ;;  %vm287_vm0 = vcmask 64512   ;;  %v1284_v0 = vmov 0.0   ;;  %v320_v1 = vld [vmem:[%s1610_s3] sm:$0xff]  ;;  %v1356_v3 = vld [vmem:[%s1607_s0 + $0x8] sm:$0xff] }
  0x14   :  { %289 = vst.msk [vmem:[#allocation3 + $0x8] sm:$0xff] %vm287_vm0, %v1284_v0  ;;  %288 = vst.msk [vmem:[#allocation3] sm:$0xff] %vm287_vm0, %v1284_v0  ;;  %v35_v2 = vld [vmem:[%s1607_s0] sm:$0xff]  ;;  %1034 = vmatprep.subr.mxu1 %v320_v1  ;;  %v1361_v4 = vld [vmem:[%s1607_s0 + $0x10] sm:$0xff] }
  0x15   :  { %290 = vst.msk [vmem:[#allocation3 + $0x10] sm:$0xff] %vm287_vm0, %v1284_v0  ;;  %291 = vst.msk [vmem:[#allocation3 + $0x18] sm:$0xff] %vm287_vm0, %v1284_v0  ;;  %1036 = vmatprep.mubr.f32.mxu1 %v35_v2  ;;  %1035 = vmatpush3.xpose.msra.mxu1 %v320_v1  ;;  %v1367_v5 = vld [vmem:[%s1607_s0 + $0x18] sm:$0xff]  ;;  %v1372_v6 = vld [vmem:[%s1607_s0 + $0x20] sm:$0xff] }
  0x16   :  { %292 = vst.msk [vmem:[#allocation3 + $0x20] sm:$0xff] %vm287_vm0, %v1284_v0  ;;  %293 = vst.msk [vmem:[#allocation3 + $0x28] sm:$0xff] %vm287_vm0, %v1284_v0  ;;  %1010 = vmatprep.mubr.f32.mxu0 %v35_v2  ;;  %v87_v7 = vld [vmem:[#allocation4] sm:$0xff]  ;;  %v88_v8 = vld [vmem:[#allocation4 + $0x8] sm:$0xff] }
  0x17   :  { %294 = vst.msk [vmem:[#allocation3 + $0x30] sm:$0xff] %vm287_vm0, %v1284_v0  ;;  %295 = vst.msk [vmem:[#allocation3 + $0x38] sm:$0xff] %vm287_vm0, %v1284_v0  ;;  %v518_v9 = vld [vmem:[%s1611_s4] sm:$0xff]  ;;  %v519_v10 = vld [vmem:[%s1611_s4 + $0x8] sm:$0xff]  ;;  %v1116_v11 = vpack.c.bf16 %v88_v8, %v87_v7 }
  0x18   :  { %296 = vst.msk [vmem:[#allocation3 + $0x40] sm:$0xff] %vm287_vm0, %v1284_v0  ;;  %297 = vst.msk [vmem:[#allocation3 + $0x48] sm:$0xff] %vm287_vm0, %v1284_v0  ;;  %1037 = vmatmul.mubr.f32.vlgmr.msra.gmra.mrb[0].mxu1 %v1356_v3  ;;  %v1148_v12 = vpack.c.bf16 %v519_v10, %v518_v9  ;;  %v89_v13 = vld [vmem:[#allocation4 + $0x10] sm:$0xff]  ;;  %v90_v14 = vld [vmem:[#allocation4 + $0x18] sm:$0xff] }
  0x19   :  { %298 = vst.msk [vmem:[#allocation3 + $0x50] sm:$0xff] %vm287_vm0, %v1284_v0  ;;  %299 = vst.msk [vmem:[#allocation3 + $0x58] sm:$0xff] %vm287_vm0, %v1284_v0  ;;  %1039 = vmatprep.mubr.f32.mxu1 %v1361_v4  ;;  %v520_v15 = vld [vmem:[%s1611_s4 + $0x10] sm:$0xff]  ;;  %v1120_v17 = vpack.c.bf16 %v90_v14, %v89_v13  ;;  %v521_v18 = vld [vmem:[%s1611_s4 + $0x18] sm:$0xff]  ;;  %1117 = vmatprep.subr.bf16.mxu0 %v1116_v11 }
  0x1a   :  { %300 = vst.msk [vmem:[#allocation3 + $0x60] sm:$0xff] %vm287_vm0, %v1284_v0  ;;  %301 = vst.msk [vmem:[#allocation3 + $0x68] sm:$0xff] %vm287_vm0, %v1284_v0  ;;  %v1154_v19 = vpack.c.bf16 %v521_v18, %v520_v15  ;;  %v1398_v20 = vld [vmem:[%s1607_s0 + $0x28] sm:$0xff]  ;;  %1119 = vmatpush3.bf16.xpose.msra.mxu0 %v1116_v11  ;;  %v1403_v21 = vld [vmem:[%s1607_s0 + $0x30] sm:$0xff] }
  0x1b   :  { %302 = vst.msk [vmem:[#allocation3 + $0x70] sm:$0xff] %vm287_vm0, %v1284_v0  ;;  %303 = vst.msk [vmem:[#allocation3 + $0x78] sm:$0xff] %vm287_vm0, %v1284_v0  ;;  %1121 = vmatprep.subr.bf16.mxu0 %v1120_v17  ;;  %v91_v22 = vld [vmem:[#allocation4 + $0x20] sm:$0xff]  ;;  %v92_v23 = vld [vmem:[#allocation4 + $0x28] sm:$0xff] }
  0x1c   :  { %vm1386_vm1 = vmpackc.low %vm287_vm0, %vm287_vm0  ;;  %1040 = vmatmul.mubr.f32.gmra.mrb[2].mxu1 %v1367_v5  ;;  %v1416_v24 = vld [vmem:[%s1607_s0 + $0x38] sm:$0xff]  ;;  %v522_v25 = vld [vmem:[%s1611_s4 + $0x20] sm:$0xff]  ;;  %v1124_v28 = vpack.c.bf16 %v92_v23, %v91_v22 }
  0x1d   :  { %1042 = vmatprep.mubr.f32.mxu1 %v1372_v6  ;;  %1150 = vmatprep.subr.msk.bf16.mxu1 %vm1386_vm1, %v1148_v12  ;;  %v523_v26 = vld [vmem:[%s1611_s4 + $0x28] sm:$0xff]  ;;  %v1427_v27 = vld [vmem:[%s1607_s0 + $0x40] sm:$0xff]  ;;  %v1439_v31 = vld [vmem:[%s1607_s0 + $0x50] sm:$0xff] }
  0x1e   :  { %1153 = vmatpush3.bf16.xpose.msk.msra.mxu1 %vm1386_vm1, %v1148_v12  ;;  %v1160_v29 = vpack.c.bf16 %v523_v26, %v522_v25  ;;  %v1434_v30 = vld [vmem:[%s1607_s0 + $0x48] sm:$0xff]  ;;  %v93_v32 = vld [vmem:[#allocation4 + $0x30] sm:$0xff]  ;;  %v94_v33 = vld [vmem:[#allocation4 + $0x38] sm:$0xff] }
  0x1f   :  { %1156 = vmatprep.subr.msk.bf16.mxu1 %vm1386_vm1, %v1154_v19  ;;  %v1450_v34 = vld [vmem:[%s1607_s0 + $0x58] sm:$0xff]  ;;  %v524_v35 = vld [vmem:[%s1611_s4 + $0x30] sm:$0xff]  ;;  %v1461_v37 = vld [vmem:[%s1607_s0 + $0x60] sm:$0xff]  ;;  %v1128_v38 = vpack.c.bf16 %v94_v33, %v93_v32 }
  0x20   :  { %1043 = vmatmul.mubr.f32.gmra.mrb[4].mxu1 %v1398_v20  ;;  %v525_v36 = vld [vmem:[%s1611_s4 + $0x38] sm:$0xff]  ;;  %v1468_v40 = vld [vmem:[%s1607_s0 + $0x68] sm:$0xff]  ;;  %v49_v41 = vld [vmem:[%s1607_s0 + $0x70] sm:$0xff] }
  0x21   :  { %1045 = vmatprep.mubr.f32.mxu1 %v1403_v21  ;;  %v1166_v39 = vpack.c.bf16 %v525_v36, %v524_v35  ;;  %v95_v42 = vld [vmem:[#allocation4 + $0x40] sm:$0xff]  ;;  %v96_v43 = vld [vmem:[#allocation4 + $0x48] sm:$0xff]  ;;  %v50_v44 = vld [vmem:[%s1607_s0 + $0x78] sm:$0xff] }
  0x22   :  { %1123 = vmatpush3.bf16.xpose.msra.mxu0 %v1120_v17  ;;  %v526_v45 = vld [vmem:[%s1611_s4 + $0x40] sm:$0xff]  ;;  %v527_v46 = vld [vmem:[%s1611_s4 + $0x48] sm:$0xff]  ;;  %v1132_v47 = vpack.c.bf16 %v96_v43, %v95_v42  ;;  %v97_v49 = vld [vmem:[#allocation4 + $0x50] sm:$0xff] }
  0x23   :  { %1125 = vmatprep.subr.bf16.mxu0 %v1124_v28  ;;  %v1172_v48 = vpack.c.bf16 %v527_v46, %v526_v45  ;;  %v98_v50 = vld [vmem:[#allocation4 + $0x58] sm:$0xff]  ;;  %v528_v51 = vld [vmem:[%s1611_s4 + $0x50] sm:$0xff]  ;;  %v99_v55 = vld [vmem:[#allocation4 + $0x60] sm:$0xff] }
  0x24   :  { %1046 = vmatmul.mubr.f32.gmra.mrb[6].mxu1 %v1416_v24  ;;  %v529_v52 = vld [vmem:[%s1611_s4 + $0x58] sm:$0xff]  ;;  %v1136_v53 = vpack.c.bf16 %v98_v50, %v97_v49  ;;  %v100_v56 = vld [vmem:[#allocation4 + $0x68] sm:$0xff]  ;;  %v530_v57 = vld [vmem:[%s1611_s4 + $0x60] sm:$0xff] }
  0x25   :  { %1048 = vmatprep.mubr.f32.mxu1 %v1427_v27  ;;  %v1178_v54 = vpack.c.bf16 %v529_v52, %v528_v51  ;;  %v531_v58 = vld [vmem:[%s1611_s4 + $0x68] sm:$0xff]  ;;  %v1140_v59 = vpack.c.bf16 %v100_v56, %v99_v55  ;;  %v101_v61 = vld [vmem:[#allocation4 + $0x70] sm:$0xff]  ;;  %v102_v62 = vld [vmem:[#allocation4 + $0x78] sm:$0xff] }
  0x26   :  { %1159 = vmatpush3.bf16.xpose.msk.msra.mxu1 %vm1386_vm1, %v1154_v19  ;;  %v1184_v60 = vpack.c.bf16 %v531_v58, %v530_v57  ;;  %v1144_v63 = vpack.c.bf16 %v102_v62, %v101_v61  ;;  %v532_v0 = vld [vmem:[%s1611_s4 + $0x70] sm:$0xff]  ;;  %v533_v1 = vld [vmem:[%s1611_s4 + $0x78] sm:$0xff]  ;;  %v309_v15 = vld [vmem:[#allocation3 + $0x28] sm:$0xff] }
  0x27   :  { %1162 = vmatprep.subr.msk.bf16.mxu1 %vm1386_vm1, %v1160_v29  ;;  %v1190_v2 = vpack.c.bf16 %v533_v1, %v532_v0  ;;  %v307_v9 = vld [vmem:[#allocation3 + $0x18] sm:$0xff]  ;;  %v306_v10 = vld [vmem:[#allocation3 + $0x10] sm:$0xff]  ;;  %v308_v16 = vld [vmem:[#allocation3 + $0x20] sm:$0xff] }
  0x28   :  { %1049 = vmatmul.mubr.f32.gmra.mrb[8].mxu1 %v1434_v30  ;;  %v310_v23 = vld [vmem:[#allocation3 + $0x30] sm:$0xff]  ;;  %v317_v45 = vld [vmem:[#allocation3 + $0x68] sm:$0xff] }
  0x29   :  { %1051 = vmatprep.mubr.f32.mxu1 %v1439_v31  ;;  %v318_v55 = vld [vmem:[#allocation3 + $0x70] sm:$0xff] }
  0x2a   :  { %1127 = vmatpush3.bf16.xpose.msra.mxu0 %v1124_v28 }
  0x2b   :  { %1129 = vmatprep.subr.bf16.mxu0 %v1128_v38 }
  0x2c   :  { %1052 = vmatmul.mubr.f32.gmra.mrb[10].mxu1 %v1450_v34 }
  0x2d   :  { %1054 = vmatprep.mubr.f32.mxu1 %v1461_v37 }
  0x2e   :  { %1165 = vmatpush3.bf16.xpose.msk.msra.mxu1 %vm1386_vm1, %v1160_v29  ;;  %v313_v29 = vld [vmem:[#allocation3 + $0x48] sm:$0xff] }
  0x2f   :  { %1168 = vmatprep.subr.msk.bf16.mxu1 %vm1386_vm1, %v1166_v39 }
  0x30   :  { %1055 = vmatmul.mubr.f32.gmra.mrb[12].mxu1 %v1468_v40 }
  0x31   :  { %1057 = vmatprep.mubr.f32.mxu1 %v49_v41 }
  0x32   :  { %1131 = vmatpush3.bf16.xpose.msra.mxu0 %v1128_v38 }
  0x33   :  { %1133 = vmatprep.subr.bf16.mxu0 %v1132_v47 }
  0x34   :  { %1058 = vmatmul.mubr.f32.gmra.mrb[14].mxu1 %v50_v44 }
  0x36   :  { %1171 = vmatpush3.bf16.xpose.msk.msra.mxu1 %vm1386_vm1, %v1166_v39  ;;  %v314_v39 = vld [vmem:[#allocation3 + $0x50] sm:$0xff] }
  0x37   :  { %1174 = vmatprep.subr.msk.bf16.mxu1 %vm1386_vm1, %v1172_v48 }
  0x3a   :  { %1135 = vmatpush3.bf16.xpose.msra.mxu0 %v1132_v47  ;;  %v316_v47 = vld [vmem:[#allocation3 + $0x60] sm:$0xff] }
  0x3b   :  { %1137 = vmatprep.subr.bf16.mxu0 %v1136_v53 }
  0x3e   :  { %1177 = vmatpush3.bf16.xpose.msk.msra.mxu1 %vm1386_vm1, %v1172_v48 }
  0x3f   :  { %1180 = vmatprep.subr.msk.bf16.mxu1 %vm1386_vm1, %v1178_v54 }
  0x42   :  { %1139 = vmatpush3.bf16.xpose.msra.mxu0 %v1136_v53  ;;  %v319_v53 = vld [vmem:[#allocation3 + $0x78] sm:$0xff] }
  0x43   :  { %1141 = vmatprep.subr.bf16.mxu0 %v1140_v59 }
  0x46   :  { %1183 = vmatpush3.bf16.xpose.msk.msra.mxu1 %vm1386_vm1, %v1178_v54 }
  0x47   :  { %1186 = vmatprep.subr.msk.bf16.mxu1 %vm1386_vm1, %v1184_v60 }
  0x4a   :  { %1143 = vmatpush3.bf16.xpose.msra.mxu0 %v1140_v59 }
  0x4b   :  { %1145 = vmatprep.subr.bf16.mxu0 %v1144_v63 }
  0x4e   :  { %1189 = vmatpush3.bf16.xpose.msk.msra.mxu1 %vm1386_vm1, %v1184_v60 }
  0x4f   :  { %1192 = vmatprep.subr.msk.bf16.mxu1 %vm1386_vm1, %v1190_v2 }
  0x52   :  { %1147 = vmatpush3.bf16.xpose.msra.mxu0 %v1144_v63 }
  0x56   :  { %1195 = vmatpush3.bf16.xpose.msk.msra.mxu1 %vm1386_vm1, %v1190_v2 }
  0x59   :  { %1011 = vmatmul.mubr.f32.vlgmr.msra.gmra.mrb[0].mxu0 %v1356_v3  ;;  %v305_v3 = vld [vmem:[#allocation3 + $0x8] sm:$0xff] }
  0x5a   :  { %1013 = vmatprep.mubr.f32.mxu0 %v1361_v4  ;;  %v304_v4 = vld [vmem:[#allocation3] sm:$0xff] }
  0x5d   :  { %1014 = vmatmul.mubr.f32.gmra.mrb[2].mxu0 %v1367_v5 }
  0x5e   :  { %1016 = vmatprep.mubr.f32.mxu0 %v1372_v6 }
  0x61   :  { %1017 = vmatmul.mubr.f32.gmra.mrb[4].mxu0 %v1398_v20 }
  0x62   :  { %1019 = vmatprep.mubr.f32.mxu0 %v1403_v21  ;;  %v311_v21 = vld [vmem:[#allocation3 + $0x38] sm:$0xff] }
  0x65   :  { %1020 = vmatmul.mubr.f32.gmra.mrb[6].mxu0 %v1416_v24 }
  0x66   :  { %1022 = vmatprep.mubr.f32.mxu0 %v1427_v27 }
  0x69   :  { %1023 = vmatmul.mubr.f32.gmra.mrb[8].mxu0 %v1434_v30 }
  0x6a   :  { %1025 = vmatprep.mubr.f32.mxu0 %v1439_v31  ;;  %v312_v31 = vld [vmem:[#allocation3 + $0x40] sm:$0xff] }
  0x6d   :  { %1026 = vmatmul.mubr.f32.gmra.mrb[10].mxu0 %v1450_v34 }
  0x6e   :  { %1028 = vmatprep.mubr.f32.mxu0 %v1461_v37  ;;  %v315_v37 = vld [vmem:[#allocation3 + $0x58] sm:$0xff] }
  0x71   :  { %1029 = vmatmul.mubr.f32.gmra.mrb[12].mxu0 %v1468_v40 }
  0x72   :  { %1031 = vmatprep.mubr.f32.mxu0 %v49_v41 }
  0x75   :  { %1032 = vmatmul.mubr.f32.gmra.mrb[14].mxu0 %v50_v44 }
  0xeb   :  { %v1038_v5 = vpop.f32.mrb[0].mxu1 }
  0xec   :  { %v467_v6 = vadd.f32 %v1038_v5, %v305_v3  ;;  %v387_v7 = vpop.f32.mrb[1].mxu1 }
  0xed   :  { %v466_v8 = vadd.f32 %v387_v7, %v304_v4 }
  0xee   :  { %484 = vst.msk [vmem:[#allocation3 + $0x8] sm:$0xff] %vm287_vm0, %v467_v6 }
  0xef   :  { %483 = vst.msk [vmem:[#allocation3] sm:$0xff] %vm287_vm0, %v466_v8  ;;  %v1041_v11 = vpop.f32.mrb[2].mxu1 }
  0xf0   :  { %v469_v12 = vadd.f32 %v1041_v11, %v307_v9  ;;  %v397_v13 = vpop.f32.mrb[3].mxu1 }
  0xf1   :  { %v468_v14 = vadd.f32 %v397_v13, %v306_v10 }
  0xf2   :  { %486 = vst.msk [vmem:[#allocation3 + $0x18] sm:$0xff] %vm287_vm0, %v469_v12 }
  0xf3   :  { %485 = vst.msk [vmem:[#allocation3 + $0x10] sm:$0xff] %vm287_vm0, %v468_v14  ;;  %v1044_v17 = vpop.f32.mrb[4].mxu1 }
  0xf4   :  { %v471_v18 = vadd.f32 %v1044_v17, %v309_v15  ;;  %v407_v19 = vpop.f32.mrb[5].mxu1 }
  0xf5   :  { %v470_v20 = vadd.f32 %v407_v19, %v308_v16  ;;  %v503_v25 = vld [vmem:[#allocation3 + $0x8] sm:$0xff] }
  0xf6   :  { %488 = vst.msk [vmem:[#allocation3 + $0x28] sm:$0xff] %vm287_vm0, %v471_v18  ;;  %v502_v22 = vld [vmem:[#allocation3] sm:$0xff] }
  0xf7   :  { %487 = vst.msk [vmem:[#allocation3 + $0x20] sm:$0xff] %vm287_vm0, %v470_v20  ;;  %v1047_v24 = vpop.f32.mrb[6].mxu1  ;;  %1092 = vmatprep.mubr.msk.f32.mxu1 %vm287_vm0, %v502_v22  ;;  %v1573_v20 = vld [vmem:[%s1609_s2] ss:$0 sm:$0xff]  ;;  %s1285_s2 = smov [#allocation7]  }
  0xf8   :  { %v473_v26 = vadd.f32 %v1047_v24, %v311_v21  ;;  %v417_v27 = vpop.f32.mrb[7].mxu1  ;;  %1093 = vmatmul.mubr.msk.f32.vlgmr.msra.gmra.mrb[16].mxu1 %vm287_vm0, %v503_v25  ;;  %s852_s21 = sshll.u32 %s1285_s2, 4  ;;  %s853_s21 = int_to_ptr.vmem [resolvable:$true] %s852_s21 }
  0xf9   :  { %v472_v28 = vadd.f32 %v417_v27, %v310_v23  ;;  %v505_v33 = vld [vmem:[#allocation3 + $0x18] sm:$0xff]  ;;  %s1255_s22 = scalar_lea.vmem %s853_s21, 2048  ;;  %p1260_p9 = scmp.lt.s32.totalorder %s853_s21, %s853_s21 }
  0xfa   :  { %490 = vst.msk [vmem:[#allocation3 + $0x38] sm:$0xff] %vm287_vm0, %v473_v26  ;;  %v504_v30 = vld [vmem:[#allocation3 + $0x10] sm:$0xff]  ;;  %p1256_p8 = scmp.ne.s32.totalorder %s853_s21, %s1255_s22  ;;  %p1261_p10 = scmp.lt.s32.totalorder %s1255_s22, %s1255_s22 }
  0xfb   :  { %489 = vst.msk [vmem:[#allocation3 + $0x30] sm:$0xff] %vm287_vm0, %v472_v28  ;;  %v1050_v32 = vpop.f32.mrb[8].mxu1  ;;  %1095 = vmatprep.mubr.msk.f32.mxu1 %vm287_vm0, %v504_v30 }
  0xfc   :  { %v475_v34 = vadd.f32 %v1050_v32, %v313_v29  ;;  %v427_v35 = vpop.f32.mrb[9].mxu1  ;;  %1096 = vmatmul.mubr.msk.f32.gmra.mrb[18].mxu1 %vm287_vm0, %v505_v33  ;;  %p1262_p11 = por %p1261_p10, %p1260_p9 }
  0xfd   :  { %v474_v36 = vadd.f32 %v427_v35, %v312_v31  ;;  %v507_v41 = vld [vmem:[#allocation3 + $0x28] sm:$0xff] }
  0xfe   :  { %492 = vst.msk [vmem:[#allocation3 + $0x48] sm:$0xff] %vm287_vm0, %v475_v34  ;;  %v506_v38 = vld [vmem:[#allocation3 + $0x20] sm:$0xff]  ;;  %p1263_p12 = pnand %p1262_p11, %p1256_p8 }
  0xff   :  { %491 = vst.msk [vmem:[#allocation3 + $0x40] sm:$0xff] %vm287_vm0, %v474_v36  ;;  %v1053_v40 = vpop.f32.mrb[10].mxu1  ;;  %1098 = vmatprep.mubr.msk.f32.mxu1 %vm287_vm0, %v506_v38 }
 0x100   :  { %v477_v42 = vadd.f32 %v1053_v40, %v315_v37  ;;  %v437_v43 = vpop.f32.mrb[11].mxu1  ;;  %1099 = vmatmul.mubr.msk.f32.gmra.mrb[20].mxu1 %vm287_vm0, %v507_v41 }
 0x101   :  { %v476_v44 = vadd.f32 %v437_v43, %v314_v39  ;;  %v509_v49 = vld [vmem:[#allocation3 + $0x38] sm:$0xff] }
 0x102   :  { %494 = vst.msk [vmem:[#allocation3 + $0x58] sm:$0xff] %vm287_vm0, %v477_v42  ;;  %v508_v46 = vld [vmem:[#allocation3 + $0x30] sm:$0xff] }
 0x103   :  { %493 = vst.msk [vmem:[#allocation3 + $0x50] sm:$0xff] %vm287_vm0, %v476_v44  ;;  %v1056_v48 = vpop.f32.mrb[12].mxu1  ;;  %1101 = vmatprep.mubr.msk.f32.mxu1 %vm287_vm0, %v508_v46 }
 0x104   :  { %v479_v50 = vadd.f32 %v1056_v48, %v317_v45  ;;  %v447_v51 = vpop.f32.mrb[13].mxu1  ;;  %1102 = vmatmul.mubr.msk.f32.gmra.mrb[22].mxu1 %vm287_vm0, %v509_v49 }
 0x105   :  { %v478_v52 = vadd.f32 %v447_v51, %v316_v47  ;;  %v511_v57 = vld [vmem:[#allocation3 + $0x48] sm:$0xff] }
 0x106   :  { %496 = vst.msk [vmem:[#allocation3 + $0x68] sm:$0xff] %vm287_vm0, %v479_v50  ;;  %v510_v54 = vld [vmem:[#allocation3 + $0x40] sm:$0xff] }
 0x107   :  { %495 = vst.msk [vmem:[#allocation3 + $0x60] sm:$0xff] %vm287_vm0, %v478_v52  ;;  %v1059_v56 = vpop.f32.mrb[14].mxu1  ;;  %1104 = vmatprep.mubr.msk.f32.mxu1 %vm287_vm0, %v510_v54 }
 0x108   :  { %v481_v58 = vadd.f32 %v1059_v56, %v319_v53  ;;  %v457_v59 = vpop.f32.mrb[15].mxu1  ;;  %1105 = vmatmul.mubr.msk.f32.gmra.mrb[24].mxu1 %vm287_vm0, %v511_v57 }
 0x109   :  { %v480_v60 = vadd.f32 %v457_v59, %v318_v55  ;;  %v513_v62 = vld [vmem:[#allocation3 + $0x58] sm:$0xff] }
 0x10a   :  { %498 = vst.msk [vmem:[#allocation3 + $0x78] sm:$0xff] %vm287_vm0, %v481_v58  ;;  %v512_v61 = vld [vmem:[#allocation3 + $0x50] sm:$0xff] }
 0x10b   :  { %497 = vst.msk [vmem:[#allocation3 + $0x70] sm:$0xff] %vm287_vm0, %v480_v60  ;;  %1107 = vmatprep.mubr.msk.f32.mxu1 %vm287_vm0, %v512_v61 }
 0x10c   :  { %1108 = vmatmul.mubr.msk.f32.gmra.mrb[26].mxu1 %vm287_vm0, %v513_v62 }
 0x10d   :  { %v515_v0 = vld [vmem:[#allocation3 + $0x68] sm:$0xff] }
 0x10e   :  { %v514_v63 = vld [vmem:[#allocation3 + $0x60] sm:$0xff] }
 0x10f   :  { %1110 = vmatprep.mubr.msk.f32.mxu1 %vm287_vm0, %v514_v63 }
 0x110   :  { %1111 = vmatmul.mubr.msk.f32.gmra.mrb[28].mxu1 %vm287_vm0, %v515_v0 }
 0x111   :  { %v517_v2 = vld [vmem:[#allocation3 + $0x78] sm:$0xff] }
 0x112   :  { %v516_v1 = vld [vmem:[#allocation3 + $0x70] sm:$0xff] }
 0x113   :  { %1113 = vmatprep.mubr.msk.f32.mxu1 %vm287_vm0, %v516_v1 }
 0x114   :  { %1114 = vmatmul.mubr.msk.f32.gmra.mrb[30].mxu1 %vm287_vm0, %v517_v2 }
 0x12c   :  { %v1012_v3 = vpop.f32.mrb[0].mxu0 }
 0x12d   :  { %v169_v4 = vpop.f32.mrb[1].mxu0 }
 0x130   :  { %v1015_v5 = vpop.f32.mrb[2].mxu0 }
 0x131   :  { %v179_v6 = vpop.f32.mrb[3].mxu0 }
 0x134   :  { %v1018_v7 = vpop.f32.mrb[4].mxu0 }
 0x135   :  { %v189_v8 = vpop.f32.mrb[5].mxu0 }
 0x138   :  { %v1021_v9 = vpop.f32.mrb[6].mxu0 }
 0x139   :  { %v199_v10 = vpop.f32.mrb[7].mxu0 }
 0x13c   :  { %v1024_v11 = vpop.f32.mrb[8].mxu0 }
 0x13d   :  { %v209_v12 = vpop.f32.mrb[9].mxu0 }
 0x140   :  { %v1027_v13 = vpop.f32.mrb[10].mxu0 }
 0x141   :  { %v219_v14 = vpop.f32.mrb[11].mxu0 }
 0x144   :  { %v1030_v15 = vpop.f32.mrb[12].mxu0 }
 0x145   :  { %v229_v16 = vpop.f32.mrb[13].mxu0 }
 0x148   :  { %v1033_v17 = vpop.f32.mrb[14].mxu0 }
 0x149   :  { %v1568_v18 = vpop.f32.mrb[15].mxu0 }
 0x1cb   :  { %v1094_v19 = vpop.f32.mrb[16].mxu1 }
 0x1cc   :  { %v1196_v21 = vadd.f32 %v1094_v19, %v1012_v3  ;;  %v697_v22 = vpop.f32.mrb[17].mxu1 }
 0x1cd   :  { %v1198_v23 = vadd.f32 %v697_v22, %v169_v4 }
 0x1ce   :  { %v1197_v24 = vadd.f32 %v1196_v21, %v1573_v20 }
 0x1cf   :  { %v1199_v25 = vadd.f32 %v1198_v23, %v1573_v20  ;;  %v1097_v26 = vpop.f32.mrb[18].mxu1 }
 0x1d0   :  { %832 = vst [vmem:[#allocation7 + $0x8] sm:$0xff] %v1197_v24  ;;  %v1200_v27 = vadd.f32 %v1097_v26, %v1015_v5  ;;  %v707_v28 = vpop.f32.mrb[19].mxu1 }
 0x1d1   :  { %831 = vst [vmem:[#allocation7] sm:$0xff] %v1199_v25  ;;  %v1202_v29 = vadd.f32 %v707_v28, %v179_v6 }
 0x1d2   :  { %v1201_v30 = vadd.f32 %v1200_v27, %v1573_v20 }
 0x1d3   :  { %v1203_v31 = vadd.f32 %v1202_v29, %v1573_v20  ;;  %v1100_v32 = vpop.f32.mrb[20].mxu1 }
 0x1d4   :  { %834 = vst [vmem:[#allocation7 + $0x18] sm:$0xff] %v1201_v30  ;;  %v1204_v33 = vadd.f32 %v1100_v32, %v1018_v7  ;;  %v717_v34 = vpop.f32.mrb[21].mxu1 }
 0x1d5   :  { %833 = vst [vmem:[#allocation7 + $0x10] sm:$0xff] %v1203_v31  ;;  %v1206_v35 = vadd.f32 %v717_v34, %v189_v8 }
 0x1d6   :  { %v1205_v36 = vadd.f32 %v1204_v33, %v1573_v20 }
 0x1d7   :  { %v1207_v37 = vadd.f32 %v1206_v35, %v1573_v20  ;;  %v1103_v38 = vpop.f32.mrb[22].mxu1 }
 0x1d8   :  { %836 = vst [vmem:[#allocation7 + $0x28] sm:$0xff] %v1205_v36  ;;  %v1208_v39 = vadd.f32 %v1103_v38, %v1021_v9  ;;  %v727_v40 = vpop.f32.mrb[23].mxu1 }
 0x1d9   :  { %835 = vst [vmem:[#allocation7 + $0x20] sm:$0xff] %v1207_v37  ;;  %v1210_v41 = vadd.f32 %v727_v40, %v199_v10 }
 0x1da   :  { %v1209_v42 = vadd.f32 %v1208_v39, %v1573_v20 }
 0x1db   :  { %v1211_v43 = vadd.f32 %v1210_v41, %v1573_v20  ;;  %v1106_v44 = vpop.f32.mrb[24].mxu1 }
 0x1dc   :  { %838 = vst [vmem:[#allocation7 + $0x38] sm:$0xff] %v1209_v42  ;;  %v1212_v45 = vadd.f32 %v1106_v44, %v1024_v11  ;;  %v737_v46 = vpop.f32.mrb[25].mxu1 }
 0x1dd   :  { %837 = vst [vmem:[#allocation7 + $0x30] sm:$0xff] %v1211_v43  ;;  %v1214_v47 = vadd.f32 %v737_v46, %v209_v12 }
 0x1de   :  { %v1213_v48 = vadd.f32 %v1212_v45, %v1573_v20 }
 0x1df   :  { %v1215_v49 = vadd.f32 %v1214_v47, %v1573_v20  ;;  %v1109_v50 = vpop.f32.mrb[26].mxu1 }
 0x1e0   :  { %840 = vst [vmem:[#allocation7 + $0x48] sm:$0xff] %v1213_v48  ;;  %v1216_v51 = vadd.f32 %v1109_v50, %v1027_v13  ;;  %v747_v52 = vpop.f32.mrb[27].mxu1 }
 0x1e1   :  { %839 = vst [vmem:[#allocation7 + $0x40] sm:$0xff] %v1215_v49  ;;  %v1218_v53 = vadd.f32 %v747_v52, %v219_v14 }
 0x1e2   :  { %v1217_v54 = vadd.f32 %v1216_v51, %v1573_v20 }
 0x1e3   :  { %v1219_v55 = vadd.f32 %v1218_v53, %v1573_v20  ;;  %v1112_v56 = vpop.f32.mrb[28].mxu1 }
 0x1e4   :  { %842 = vst [vmem:[#allocation7 + $0x58] sm:$0xff] %v1217_v54  ;;  %v1220_v57 = vadd.f32 %v1112_v56, %v1030_v15  ;;  %v757_v58 = vpop.f32.mrb[29].mxu1 }
 0x1e5   :  { %841 = vst [vmem:[#allocation7 + $0x50] sm:$0xff] %v1219_v55  ;;  %v1222_v59 = vadd.f32 %v757_v58, %v229_v16 }
 0x1e6   :  { %v1221_v60 = vadd.f32 %v1220_v57, %v1573_v20 }
 0x1e7   :  { %v1223_v61 = vadd.f32 %v1222_v59, %v1573_v20  ;;  %v1115_v62 = vpop.f32.mrb[30].mxu1 }
 0x1e8   :  { %844 = vst [vmem:[#allocation7 + $0x68] sm:$0xff] %v1221_v60  ;;  %v1224_v63 = vadd.f32 %v1115_v62, %v1033_v17  ;;  %v767_v0 = vpop.f32.mrb[31].mxu1 }
 0x1e9   :  { %843 = vst [vmem:[#allocation7 + $0x60] sm:$0xff] %v1223_v61  ;;  %v1226_v1 = vadd.f32 %v767_v0, %v1568_v18 }
 0x1ea   :  { %v1225_v2 = vadd.f32 %v1224_v63, %v1573_v20 }
 0x1eb   :  { %v1227_v3 = vadd.f32 %v1226_v1, %v1573_v20 }
 0x1ec   :  { %846 = vst [vmem:[#allocation7 + $0x78] sm:$0xff] %v1225_v2 }
 0x1ed   :  { %845 = vst [vmem:[#allocation7 + $0x70] sm:$0xff] %v1227_v3 }
 0x1ee   :  { %1266 = shalt.err (!%p1263_p12)
}
 0x1ef   :  { %s1267_s25 = scalar_lea.hbm %s1612_s5, 2048 }
 0x1f0   :  { %p1268_p13 = scmp.ne.s32.totalorder %s1612_s5, %s1267_s25  ;;  %p1271_p0 = scmp.lt.u32.totalorder %s1267_s25, %s1612_s5 }
 0x1f2   :  { %p1273_p1 = pnand %p1271_p0, %p1268_p13 }
 0x1f4   :  { %1276 = shalt.err (!%p1273_p1)
}
 0x1f5   :  { %858 = dma.vmem_to_hbm [thread:$0]  %s853_s21, 2048, %s1612_s5, [#allocation6], %s1282_s28, %s1282_s28, %s1283_s29  }
 0x1f6   :  { %1279 = dma.done.wait [#allocation6], 2048  }
 0x1f7   :  { %1280 = vsyncadd [#allocation6], 4294965248 }
 0x1f8   :  { %862 = vsyncpa [#allocation5], 1 }
 0x1f9   :  { %863 = vsyncpa [#allocation6], 1 }

</bundles_post_ra>
